<compile_context>
chip_gen: v6e
topology: v6e:2x2x1
jax: 0.10.0
libtpu: 0.0.40
codegen_flags: <defaults>
</compile_context>

<pallas_src>
import jax
import jax.numpy as jnp
from jax.experimental import pallas as pl
from jax.experimental.pallas import tpu as pltpu


def _our_module_kernel(x_ref, w1_ref, b1_ref, w2_ref, b2_ref, w3_ref, b3_ref,
                       mask_ref, o_ref):
    # Linear(num_inputs, 5) + ReLU
    x = x_ref[...]
    h1 = jnp.dot(x, w1_ref[...], preferred_element_type=jnp.float32) + b1_ref[...]
    h1 = jnp.maximum(h1, 0.0)

    # Linear(5, 20) + ReLU
    h2 = jnp.dot(h1, w2_ref[...], preferred_element_type=jnp.float32) + b2_ref[...]
    h2 = jnp.maximum(h2, 0.0)

    # Linear(20, num_classes)
    logits = jnp.dot(h2, w3_ref[...], preferred_element_type=jnp.float32) + b3_ref[...]

    # Dropout: mask is pre-scaled in the wrapper (0 or 1/(1-p)), so a single
    # elementwise multiply implements PyTorch training-mode dropout.  In eval
    # mode the mask is a broadcastable (1, C) block of ones.
    logits = logits * mask_ref[...]

    # Softmax(dim=1)  (dim 1 == last axis of the 2-D [batch, classes] tensor)
    m = jnp.max(logits, axis=-1, keepdims=True)
    e = jnp.exp(logits - m)
    o_ref[...] = e / jnp.sum(e, axis=-1, keepdims=True)


def our_module_forward(x, params, *, dropout_prob=0.3, training=True,
                       rng_key=None, block_batch=512):
    """Pallas implementation of OurModule.forward.

    x:      [B, num_inputs] float32
    params: dict with w1[(D,5)], b1[(1,5)], w2[(5,20)], b2[(1,20)],
            w3[(20,C)], b3[(1,C)]
    rng_key: jax.random key for the dropout mask (only used when training
             and dropout_prob > 0).
    """
    B, D = x.shape
    C = params["w3"].shape[1]

    # Batch tile: multiple of 8 (sublane constraint), capped at `block_batch`.
    TB = min(block_batch, ((B + 7) // 8) * 8)
    TB = max(8, ((TB + 7) // 8) * 8)
    Bp = pl.cdiv(B, TB) * TB
    if Bp != B:
        # Pad batch so every block is full; padded rows are dropped afterwards.
        x = jnp.pad(x, ((0, Bp - B), (0, 0)))

    apply_dropout = bool(training) and float(dropout_prob) > 0.0
    if apply_dropout:
        if rng_key is None:
            rng_key = jax.random.PRNGKey(0)
        keep = jax.random.bernoulli(rng_key, 1.0 - float(dropout_prob), (B, C))
        mask = keep.astype(jnp.float32) * (1.0 / (1.0 - float(dropout_prob)))
        if Bp != B:
            mask = jnp.pad(mask, ((0, Bp - B), (0, 0)), constant_values=1.0)
        mask_spec = pl.BlockSpec((TB, C), lambda i: (i, 0))      # tiled with x
    else:
        mask = jnp.ones((1, C), jnp.float32)                      # broadcast
        mask_spec = pl.BlockSpec((1, C), lambda i: (0, 0))

    def const_spec(shape):
        # Weights/biases: single block, constant index map -> stay VMEM-resident.
        return pl.BlockSpec(shape, lambda i: (0, 0))

    out = pl.pallas_call(
        _our_module_kernel,
        out_shape=jax.ShapeDtypeStruct((Bp, C), jnp.float32),
        grid=(Bp // TB,),
        in_specs=[
            pl.BlockSpec((TB, D), lambda i: (i, 0)),   # x (tiled over batch)
            const_spec(params["w1"].shape),            # w1
            const_spec(params["b1"].shape),            # b1
            const_spec(params["w2"].shape),            # w2
            const_spec(params["b2"].shape),            # b2
            const_spec(params["w3"].shape),            # w3
            const_spec(params["b3"].shape),            # b3
            mask_spec,                                 # dropout mask
        ],
        out_specs=pl.BlockSpec((TB, C), lambda i: (i, 0)),
        compiler_params=pltpu.CompilerParams(
            dimension_semantics=("parallel",)),
    )(x, params["w1"], params["b1"], params["w2"], params["b2"],
      params["w3"], params["b3"], mask)

    return out[:B] if Bp != B else out


def init_params(key, num_inputs, num_classes):
    """Deterministic PyTorch-style uniform(-1/sqrt(fan_in), 1/sqrt(fan_in)) init."""
    ks = jax.random.split(key, 6)

    def lin(kw, kb, fan_in, fan_out):
        bound = 1.0 / jnp.sqrt(float(fan_in))
        w = jax.random.uniform(kw, (fan_in, fan_out), jnp.float32, -bound, bound)
        b = jax.random.uniform(kb, (1, fan_out), jnp.float32, -bound, bound)
        return w, b

    w1, b1 = lin(ks[0], ks[1], num_inputs, 5)
    w2, b2 = lin(ks[2], ks[3], 5, 20)
    w3, b3 = lin(ks[4], ks[5], 20, num_classes)
    return {"w1": w1, "b1": b1, "w2": w2, "b2": b2, "w3": w3, "b3": b3}


if __name__ == "__main__":
    key = jax.random.PRNGKey(0)
    k_x, k_p, k_drop = jax.random.split(key, 3)

    batch, num_inputs, num_classes = 8, 32, 10
    x = jax.random.normal(k_x, (batch, num_inputs), jnp.float32)
    params = init_params(k_p, num_inputs, num_classes)

    # Training-mode forward (dropout active), matching the default PyTorch mode.
    out = our_module_forward(x, params, dropout_prob=0.3, training=True,
                             rng_key=k_drop)
    out = jax.block_until_ready(out)

    # Eval-mode forward (dropout disabled) also exercised once.
    out_eval = our_module_forward(x, params, dropout_prob=0.3, training=False)
    out_eval = jax.block_until_ready(out_eval)

    # sanity: shape, finiteness, and softmax rows sum to 1
    assert out.shape == (batch, num_classes)
    assert out_eval.shape == (batch, num_classes)
    assert bool(jnp.all(jnp.abs(jnp.sum(out, axis=1) - 1.0) < 1e-4))
    assert bool(jnp.all(jnp.abs(jnp.sum(out_eval, axis=1) - 1.0) < 1e-4))
    assert bool(jnp.all(jnp.isfinite(out)))
    assert bool(jnp.all(jnp.isfinite(out_eval)))
    print("KERNEL_OK")
</pallas_src>

<mosaic_0001>
module attributes {stable_mosaic.version = 11 : i64} {
  func.func @_our_module_kernel(%arg0: i32, %arg1: memref<8x32xf32, #tpu.memory_space<vmem>>, %arg2: memref<32x5xf32, #tpu.memory_space<vmem>>, %arg3: memref<1x5xf32, #tpu.memory_space<vmem>>, %arg4: memref<5x20xf32, #tpu.memory_space<vmem>>, %arg5: memref<1x20xf32, #tpu.memory_space<vmem>>, %arg6: memref<20x10xf32, #tpu.memory_space<vmem>>, %arg7: memref<1x10xf32, #tpu.memory_space<vmem>>, %arg8: memref<8x10xf32, #tpu.memory_space<vmem>>, %arg9: memref<8x10xf32, #tpu.memory_space<vmem>>) attributes {dimension_semantics = [#tpu.dimension_semantics<parallel>], iteration_bounds = array<i64: 1>, scalar_prefetch = 0 : i64, scratch_operands = 0 : i64, tpu.core_type = #tpu.core_type<tc>, window_params = [{transform_indices = @transform_0, window_bounds = array<i64: 8, 32>}, {pipeline_mode = #tpu.pipeline_mode<synchronous>, transform_indices = @transform_1, window_bounds = array<i64: 32, 5>}, {pipeline_mode = #tpu.pipeline_mode<synchronous>, transform_indices = @transform_2, window_bounds = array<i64: 1, 5>}, {pipeline_mode = #tpu.pipeline_mode<synchronous>, transform_indices = @transform_3, window_bounds = array<i64: 5, 20>}, {pipeline_mode = #tpu.pipeline_mode<synchronous>, transform_indices = @transform_4, window_bounds = array<i64: 1, 20>}, {pipeline_mode = #tpu.pipeline_mode<synchronous>, transform_indices = @transform_5, window_bounds = array<i64: 20, 10>}, {pipeline_mode = #tpu.pipeline_mode<synchronous>, transform_indices = @transform_6, window_bounds = array<i64: 1, 10>}, {transform_indices = @transform_7, window_bounds = array<i64: 8, 10>}, {transform_indices = @transform_8, window_bounds = array<i64: 8, 10>}]} {
    %c0 = arith.constant 0 : index
    %c0_0 = arith.constant 0 : index
    %0 = vector.load %arg1[%c0, %c0_0] : memref<8x32xf32, #tpu.memory_space<vmem>>, vector<8x32xf32>
    %c0_1 = arith.constant 0 : index
    %c0_2 = arith.constant 0 : index
    %1 = vector.load %arg2[%c0_1, %c0_2] : memref<32x5xf32, #tpu.memory_space<vmem>>, vector<32x5xf32>
    %cst = arith.constant dense<0.000000e+00> : vector<8x5xf32>
    %2 = tpu.matmul %0, %1, %cst {dimension_numbers = #tpu.dot_dimension_numbers<[1], [0], [0], [1], [0, 0, 1, 1], [], []>} : vector<8x32xf32>, vector<32x5xf32>, vector<8x5xf32> -> vector<8x5xf32>
    %c0_3 = arith.constant 0 : index
    %c0_4 = arith.constant 0 : index
    %3 = vector.load %arg3[%c0_3, %c0_4] : memref<1x5xf32, #tpu.memory_space<vmem>>, vector<1x5xf32>
    %4 = vector.broadcast %3 : vector<1x5xf32> to vector<8x5xf32>
    %5 = arith.addf %2, %4 : vector<8x5xf32>
    %cst_5 = arith.constant 0.000000e+00 : f32
    %6 = vector.broadcast %cst_5 : f32 to vector<8x5xf32>
    %7 = arith.maximumf %5, %6 : vector<8x5xf32>
    %c0_6 = arith.constant 0 : index
    %c0_7 = arith.constant 0 : index
    %8 = vector.load %arg4[%c0_6, %c0_7] : memref<5x20xf32, #tpu.memory_space<vmem>>, vector<5x20xf32>
    %cst_8 = arith.constant dense<0.000000e+00> : vector<8x20xf32>
    %9 = tpu.matmul %7, %8, %cst_8 {dimension_numbers = #tpu.dot_dimension_numbers<[1], [0], [0], [1], [0, 0, 1, 1], [], []>} : vector<8x5xf32>, vector<5x20xf32>, vector<8x20xf32> -> vector<8x20xf32>
    %c0_9 = arith.constant 0 : index
    %c0_10 = arith.constant 0 : index
    %10 = vector.load %arg5[%c0_9, %c0_10] : memref<1x20xf32, #tpu.memory_space<vmem>>, vector<1x20xf32>
    %11 = vector.broadcast %10 : vector<1x20xf32> to vector<8x20xf32>
    %12 = arith.addf %9, %11 : vector<8x20xf32>
    %cst_11 = arith.constant 0.000000e+00 : f32
    %13 = vector.broadcast %cst_11 : f32 to vector<8x20xf32>
    %14 = arith.maximumf %12, %13 : vector<8x20xf32>
    %c0_12 = arith.constant 0 : index
    %c0_13 = arith.constant 0 : index
    %15 = vector.load %arg6[%c0_12, %c0_13] : memref<20x10xf32, #tpu.memory_space<vmem>>, vector<20x10xf32>
    %cst_14 = arith.constant dense<0.000000e+00> : vector<8x10xf32>
    %16 = tpu.matmul %14, %15, %cst_14 {dimension_numbers = #tpu.dot_dimension_numbers<[1], [0], [0], [1], [0, 0, 1, 1], [], []>} : vector<8x20xf32>, vector<20x10xf32>, vector<8x10xf32> -> vector<8x10xf32>
    %c0_15 = arith.constant 0 : index
    %c0_16 = arith.constant 0 : index
    %17 = vector.load %arg7[%c0_15, %c0_16] : memref<1x10xf32, #tpu.memory_space<vmem>>, vector<1x10xf32>
    %18 = vector.broadcast %17 : vector<1x10xf32> to vector<8x10xf32>
    %19 = arith.addf %16, %18 : vector<8x10xf32>
    %c0_17 = arith.constant 0 : index
    %c0_18 = arith.constant 0 : index
    %20 = vector.load %arg8[%c0_17, %c0_18] : memref<8x10xf32, #tpu.memory_space<vmem>>, vector<8x10xf32>
    %21 = arith.mulf %19, %20 : vector<8x10xf32>
    %cst_19 = arith.constant dense<0xFF800000> : vector<8xf32>
    %22 = vector.multi_reduction <maximumf>, %21, %cst_19 [1] : vector<8x10xf32> to vector<8xf32>
    %23 = vector.shape_cast %22 : vector<8xf32> to vector<8x1xf32>
    %24 = vector.broadcast %23 : vector<8x1xf32> to vector<8x10xf32>
    %25 = arith.subf %21, %24 : vector<8x10xf32>
    %26 = math.exp %25 : vector<8x10xf32>
    %cst_20 = arith.constant dense<0.000000e+00> : vector<8xf32>
    %27 = vector.multi_reduction <add>, %26, %cst_20 [1] : vector<8x10xf32> to vector<8xf32>
    %28 = vector.shape_cast %27 : vector<8xf32> to vector<8x1xf32>
    %29 = vector.broadcast %28 : vector<8x1xf32> to vector<8x10xf32>
    %30 = arith.divf %26, %29 : vector<8x10xf32>
    %c0_21 = arith.constant 0 : index
    %c0_22 = arith.constant 0 : index
    %31 = vector.load %arg9[%c0_21, %c0_22] : memref<8x10xf32, #tpu.memory_space<vmem>>, vector<8x10xf32>
    tpu.vector_store %arg9[%c0_21, %c0_22], %30 {strides = array<i32>} : memref<8x10xf32, #tpu.memory_space<vmem>>, vector<8x10xf32>,
    return
  }
  func.func @transform_0(%arg0: i32) -> (i32, i32) {
    %c0_i32 = arith.constant 0 : i32
    %c0_i32_0 = arith.constant 0 : i32
    return %arg0, %c0_i32 : i32, i32
  }
  func.func @transform_1(%arg0: i32) -> (i32, i32) {
    %c0_i32 = arith.constant 0 : i32
    %c0_i32_0 = arith.constant 0 : i32
    %c0_i32_1 = arith.constant 0 : i32
    return %c0_i32, %c0_i32_0 : i32, i32
  }
  func.func @transform_2(%arg0: i32) -> (i32, i32) {
    %c0_i32 = arith.constant 0 : i32
    %c0_i32_0 = arith.constant 0 : i32
    %c0_i32_1 = arith.constant 0 : i32
    return %c0_i32, %c0_i32_0 : i32, i32
  }
  func.func @transform_3(%arg0: i32) -> (i32, i32) {
    %c0_i32 = arith.constant 0 : i32
    %c0_i32_0 = arith.constant 0 : i32
    %c0_i32_1 = arith.constant 0 : i32
    return %c0_i32, %c0_i32_0 : i32, i32
  }
  func.func @transform_4(%arg0: i32) -> (i32, i32) {
    %c0_i32 = arith.constant 0 : i32
    %c0_i32_0 = arith.constant 0 : i32
    %c0_i32_1 = arith.constant 0 : i32
    return %c0_i32, %c0_i32_0 : i32, i32
  }
  func.func @transform_5(%arg0: i32) -> (i32, i32) {
    %c0_i32 = arith.constant 0 : i32
    %c0_i32_0 = arith.constant 0 : i32
    %c0_i32_1 = arith.constant 0 : i32
    return %c0_i32, %c0_i32_0 : i32, i32
  }
  func.func @transform_6(%arg0: i32) -> (i32, i32) {
    %c0_i32 = arith.constant 0 : i32
    %c0_i32_0 = arith.constant 0 : i32
    %c0_i32_1 = arith.constant 0 : i32
    return %c0_i32, %c0_i32_0 : i32, i32
  }
  func.func @transform_7(%arg0: i32) -> (i32, i32) {
    %c0_i32 = arith.constant 0 : i32
    %c0_i32_0 = arith.constant 0 : i32
    return %arg0, %c0_i32 : i32, i32
  }
  func.func @transform_8(%arg0: i32) -> (i32, i32) {
    %c0_i32 = arith.constant 0 : i32
    %c0_i32_0 = arith.constant 0 : i32
    return %arg0, %c0_i32 : i32, i32
  }
}

</mosaic_0001>

<bundles_post_ra>
// kernel: tpu_custom_call.1
= control target key start
LH: loop header
LB: loop body
LE: loop exit
PB: predicated region body
PF: predicated region fallthrough
CT: control target
= control target key end

     0   :  { %v394_v1 = vmov 0.0   ;;  %vm395_vm0 = vmmov 0   ;;  %s490_s0 = inlined_call_operand.vmem [shape: f32[8,32], index: 0, kind: input, shape index: {}]   ;;  %s491_s1 = inlined_call_operand.vmem [shape: f32[32,5], index: 1, kind: input, shape index: {}]   ;;  %s492_s2 = inlined_call_operand.vmem [shape: f32[1,5], index: 2, kind: input, shape index: {}]   ;;  %s493_s3 = inlined_call_operand.vmem [shape: f32[5,20], index: 3, kind: input, shape index: {}]   ;;  %s494_s4 = inlined_call_operand.vmem [shape: f32[1,20], index: 4, kind: input, shape index: {}]   ;;  %s495_s5 = inlined_call_operand.vmem [shape: f32[20,10], index: 5, kind: input, shape index: {}]   ;;  %s496_s6 = inlined_call_operand.vmem [shape: f32[1,10], index: 6, kind: input, shape index: {}]   ;;  %s497_s7 = inlined_call_operand.vmem [shape: f32[8,10], index: 7, kind: input, shape index: {}]   ;;  %s498_s8 = inlined_call_operand.hbm [shape: f32[8,10], index: 8, kind: output, shape index: {}]  }
   0x1   :  { %v34_v0 = vld [vmem:[%s491_s1 + $0x18] sm:$0xff]  ;;  %340 = vmatprep.subr.mxu0 %v394_v1  ;;  %v33_v2 = vld [vmem:[%s491_s1 + $0x10] sm:$0xff]  ;;  %348 = vmatprep.mubr.msk.f32.mxu0 %vm395_vm0, %v394_v1 }
   0x2   :  { %341 = vmatpush3.msra.mxu0 %v34_v0  ;;  %351 = vmatprep.subr.mxu1 %v394_v1 }
   0x3   :  { %13 = vsyncpa [#allocation3], 0  ;;  %342 = vmatprep.subr.mxu0 %v394_v1  ;;  %v32_v3 = vld [vmem:[%s491_s1 + $0x8] sm:$0xff]  ;;  %353 = vmatprep.mubr.msk.f32.mxu1 %vm395_vm0, %v394_v1  ;;  %v31_v4 = vld [vmem:[%s491_s1] sm:$0xff]  ;;  %vm42_vm1 = vcmask 261120   ;;  %vm129_vm2 = vcmask 1044480  }
   0x4   :  { %343 = vmatpush3.msra.mxu0 %v33_v2  ;;  %v30_v5 = vld [vmem:[%s490_s0] sm:$0xff]  ;;  %vm125_vm3 = vcmask 39936   ;;  %v206_v12 = vld [vmem:[%s495_s5 + $0x10] sm:$0xf]  ;;  %vm218_vm4 = vcmask 1043456   ;;  %v205_v13 = vld [vmem:[%s495_s5 + $0x8] sm:$0xff] }
   0x5   :  { %344 = vmatprep.subr.mxu0 %v394_v1  ;;  %v117_v6 = vld [vmem:[%s493_s3] sm:$0x1f]  ;;  %vm214_vm5 = vcmask 162816   ;;  %vm294_vm6 = vcmask 80896  }
   0x6   :  { %345 = vmatpush3.msra.mxu0 %v32_v3  ;;  %352 = vmatpush3.msk.msra.mxu1 %vm129_vm2, %v117_v6  ;;  %v321_v7 = vld [vmem:[%s492_s2] ss:$0 sm:$0xff] }
   0x7   :  { %346 = vmatprep.subr.mxu0 %v394_v1  ;;  %356 = vmatprep.subr.mxu1 %v394_v1  ;;  %v204_v14 = vld [vmem:[%s495_s5] sm:$0xff] }
   0x8   :  { %347 = vmatpush3.msra.mxu0 %v31_v4  ;;  %v323_v15 = vld [vmem:[%s494_s4] ss:$0 sm:$0xff]  ;;  %s396_s4 = smov [#allocation2]  }
   0x9   :  { %349 = vmatmul.mubr.msk.f32.vlgmr.msra.gmra.mxu0 %vm42_vm1, %v30_v5  ;;  %v326_v20 = vld [vmem:[%s496_s6] ss:$0 sm:$0xff]  ;;  %s313_s5 = sshll.u32 %s396_s4, 4  ;;  %s314_s5 = int_to_ptr.vmem [resolvable:$true] %s313_s5 }
   0xa   :  { %v292_v22 = vld [vmem:[%s497_s7] sm:$0xff]  ;;  %s372_s6 = scalar_lea.vmem %s314_s5, 128  ;;  %p377_p1 = scmp.lt.s32.totalorder %s314_s5, %s314_s5 }
   0xb   :  { %p373_p0 = scmp.ne.s32.totalorder %s314_s5, %s372_s6  ;;  %p378_p2 = scmp.lt.s32.totalorder %s372_s6, %s372_s6 }
   0xd   :  { %p379_p3 = por %p378_p2, %p377_p1 }
   0xf   :  { %p380_p4 = pnand %p379_p3, %p373_p0 }
  0xc9   :  { %v112_v8 = vpop.f32.mrf.mxu0 }
  0xca   :  { %v113_v9 = vadd.f32 %v321_v7, %v112_v8 }
  0xcb   :  { %v350_v10 = vpop.f32.mrf.mxu0 }
  0xcc   :  { %v116_v11 = vmax.f32 %v113_v9, 0.0 }
  0xce   :  { %354 = vmatmul.mubr.msk.f32.vlgmr.msra.gmra.mxu1 %vm125_vm3, %v116_v11 }
  0xcf   :  { %362 = vmatprep.mubr.msk.f32.mxu1 %vm395_vm0, %v394_v1  ;;  %357 = vmatpush3.msk.msra.mxu1 %vm218_vm4, %v206_v12 }
  0xd0   :  { %358 = vmatprep.subr.mxu1 %v394_v1 }
  0xd1   :  { %359 = vmatpush3.msra.mxu1 %v205_v13 }
  0xd2   :  { %360 = vmatprep.subr.mxu1 %v394_v1 }
  0xd3   :  { %361 = vmatpush3.msra.mxu1 %v204_v14 }
 0x18e   :  { %v199_v16 = vpop.f32.mrf.mxu1 }
 0x18f   :  { %v200_v17 = vadd.f32 %v323_v15, %v199_v16 }
 0x190   :  { %v355_v18 = vpop.f32.mrf.mxu1 }
 0x191   :  { %v203_v19 = vmax.f32 %v200_v17, 0.0 }
 0x193   :  { %363 = vmatmul.mubr.msk.f32.vlgmr.msra.gmra.mxu1 %vm214_vm5, %v203_v19 }
 0x253   :  { %v288_v21 = vpop.f32.mrf.mxu1 }
 0x254   :  { %v289_v23 = vadd.f32 %v326_v20, %v288_v21 }
 0x255   :  { %v364_v24 = vpop.f32.mrf.mxu1 }
 0x256   :  { %v293_v25 = vmul.f32 %v292_v22, %v289_v23 }
 0x258   :  { %v295_v26 = vsel %vm294_vm6, %v293_v25, -inf }
 0x259   :  { %296 = vmax.xlane.f32.xlu0 %v295_v26 }
 0x2e2   :  { %v297_v27 = vpop.xlane.xlu0 %296 }
 0x2e3   :  { %v298_v28 = vsub.f32 %v293_v25, %v297_v27 }
 0x2e5   :  { %v299_v29 = vmul.f32 1.442695, %v298_v28 }
 0x2e7   :  { %368 = vpow2.f32 %v299_v29 }
 0x2f4   :  { %v369_v30 = vpop.eup %368 }
 0x2f5   :  { %v301_v31 = vsel %vm294_vm6, %v369_v30, 0.0 }
 0x2f6   :  { %302 = vadd.xlane.f32.xlu0 %v301_v31 }
 0x37f   :  { %v303_v32 = vpop.xlane.xlu0 %302 }
 0x380   :  { %370 = vrcp.f32 %v303_v32 }
 0x38d   :  { %v371_v33 = vpop.eup %370 }
 0x38e   :  { %v305_v34 = vmul.f32 %v371_v33, %v369_v30 }
 0x390   :  { %306 = vst.msk [vmem:[#allocation2] sm:$0xff] %vm294_vm6, %v305_v34 }
 0x391   :  { %383 = shalt.err (!%p380_p4)
}
 0x392   :  { %316 = dma.vmem_to_hbm [thread:$0]  %s314_s5, 128, %s498_s8, [#allocation3]  }
 0x393   :  { %392 = dma.done.wait [#allocation3], 128  }
 0x394   :  { %393 = vsyncadd [#allocation3], 4294967168 }
 0x395   :  { %320 = vsyncpa [#allocation3], 1 }

</bundles_post_ra>
